<compile_context>
chip_gen: v5e
topology: v5e:2x2
jax: 0.10.0
libtpu: 0.0.40
codegen_flags: <defaults>
</compile_context>

<pallas_src>
import math

import jax
import jax.numpy as jnp
from jax.experimental import pallas as pl
from jax.experimental.pallas import tpu as pltpu


# -----------------------------------------------------------------------------
# Pallas kernel: LayerNorm (stats only) + 2-layer MLP + fused head clamps/noise
# -----------------------------------------------------------------------------
def policy_fwd_kernel(state_ref, noise_ref, w1_ref, b1_ref, w2_ref, b2_ref, out_ref):
    x = state_ref[...].astype(jnp.float32)                      # (TB, S)

    # --- LayerNorm(state_dim), eps = 1e-5 (PyTorch default). Affine params are
    #     folded into W1'/b1' outside the kernel, so only normalization is done here.
    mu = jnp.mean(x, axis=-1, keepdims=True)
    xc = x - mu
    var = jnp.mean(xc * xc, axis=-1, keepdims=True)
    xn = xc * jax.lax.rsqrt(var + 1e-5)

    # --- Dropout(p=0.1): eval-mode => identity ---

    # --- Stage-1 progressive MLP: relu(xn @ W1' + b1') @ W2 + b2 (f32 accumulate) ---
    h = jnp.dot(xn, w1_ref[...], preferred_element_type=jnp.float32) + b1_ref[...]
    h = jnp.maximum(h, 0.0)
    out = jnp.dot(h, w2_ref[...], preferred_element_type=jnp.float32) + b2_ref[...]  # (TB, 2A)

    # noise_ref carries 0.01*N(0,1) in the mean columns and zeros in the log_std
    # columns, so one add applies the perturbation exactly where PyTorch does.
    out = out + noise_ref[...]

    # --- Heads: columns [0, A) = mean, [A, 2A) = log_std, written as one slab ---
    a_dim = out_ref.shape[-1] // 2
    col = jax.lax.broadcasted_iota(jnp.int32, out.shape, dimension=1)
    is_mean = col < a_dim
    out_ref[...] = jnp.where(is_mean,
                             jnp.clip(out, -10.0, 10.0),   # mean = clamp(mean+noise)
                             jnp.clip(out, -20.0, 2.0))    # log_std = clamp(log_std)


# -----------------------------------------------------------------------------
# Parameter initialization (deterministic, mimics the PyTorch __init__)
# -----------------------------------------------------------------------------
def xavier_uniform(key, fan_in, fan_out, gain=0.1):
    bound = gain * math.sqrt(6.0 / (fan_in + fan_out))
    # stored as (in, out) so the kernel can do x @ W
    return jax.random.uniform(key, (fan_in, fan_out), jnp.float32, -bound, bound)


def init_params(key, state_dim, action_dim, hidden_dim):
    k1, k2 = jax.random.split(key)
    return {
        "ln_w": jnp.ones((1, state_dim), jnp.float32),
        "ln_b": jnp.zeros((1, state_dim), jnp.float32),
        "w1": xavier_uniform(k1, state_dim, hidden_dim),
        "b1": jnp.zeros((1, hidden_dim), jnp.float32),
        "w2": xavier_uniform(k2, hidden_dim, 2 * action_dim),
        "b2": jnp.zeros((1, 2 * action_dim), jnp.float32),
    }


def fold_layernorm_affine(params):
    """Fold LayerNorm's (gamma, beta) into the first Linear: W1', b1'."""
    w1f = params["w1"] * params["ln_w"].reshape(-1, 1)           # (S, H)
    b1f = params["b1"] + params["ln_b"] @ params["w1"]           # (1, H)
    return w1f, b1f


# -----------------------------------------------------------------------------
# Batch-tile selection (no-pad where possible, v7x dual-TC friendly)
# -----------------------------------------------------------------------------
def _choose_block_b(batch, cap=2048):
    """Returns (block_b, needs_pad).  block_b is a multiple of 8 (f32 sublanes)
    or the full batch, divides the batch when possible (no wrapper pad), stays
    under `cap` rows, and gives >= 2 grid steps for mid/large batches so the
    'parallel' axis can shard across two TensorCores (v7x)."""
    if batch <= cap:
        half = batch // 2
        if batch >= 256 and batch % 2 == 0 and half % 8 == 0:
            return half, False           # two equal tiles -> megacore split
        return batch, False              # single full-batch tile, no pad
    bb = (cap // 8) * 8
    while bb >= 8:
        if batch % bb == 0:
            return bb, False
        bb -= 8
    # No clean divisor: fall back to padding the ragged tail.
    # TODO(synk): handle the ragged tail with a second small pallas_call instead.
    return (cap // 8) * 8, True


# -----------------------------------------------------------------------------
# Wrapper
# -----------------------------------------------------------------------------
def progressive_policy_forward(state, params, noise_key, *, block_b=None):
    B, S = state.shape
    H = params["w1"].shape[1]
    two_a = params["w2"].shape[1]
    A = two_a // 2

    w1f, b1f = fold_layernorm_affine(params)

    if block_b is None:
        block_b, needs_pad = _choose_block_b(B)
    else:
        needs_pad = (B % block_b) != 0
    nb = pl.cdiv(B, block_b)
    b_pad = nb * block_b

    # Host-side mean-perturbation noise: 0.01*N(0,1) in the mean half, zeros in
    # the log_std half (one lane-dense slab; no in-kernel select on the noise).
    noise_mean = 0.01 * jax.random.normal(noise_key, (b_pad, A), jnp.float32)
    noise = jnp.concatenate([noise_mean, jnp.zeros((b_pad, A), jnp.float32)], axis=-1)

    if needs_pad and b_pad != B:
        state = jnp.pad(state, ((0, b_pad - B), (0, 0)))

    # VMEM budget from the actual footprint (double-buffered tiles + resident
    # weights), floored at 4 MiB, capped well within v7x's 64 MiB per-TC VMEM.
    tile_bytes = block_b * (S + 2 * two_a) * 4
    weight_bytes = (S * H + H + H * two_a + two_a) * 4
    vmem_limit = int(min(64 * 1024 * 1024,
                         max(4 * 1024 * 1024, 4 * (tile_bytes + weight_bytes))))

    grid_spec = pltpu.PrefetchScalarGridSpec(
        num_scalar_prefetch=0,
        grid=(nb,),
        in_specs=[
            pl.BlockSpec((block_b, S), lambda i: (i, 0)),      # state tile
            pl.BlockSpec((block_b, two_a), lambda i: (i, 0)),  # noise tile
            pl.BlockSpec((S, H), lambda i: (0, 0)),            # W1' (resident)
            pl.BlockSpec((1, H), lambda i: (0, 0)),            # b1' (resident)
            pl.BlockSpec((H, two_a), lambda i: (0, 0)),        # W2  (resident)
            pl.BlockSpec((1, two_a), lambda i: (0, 0)),        # b2  (resident)
        ],
        out_specs=pl.BlockSpec((block_b, two_a), lambda i: (i, 0)),
    )

    out = pl.pallas_call(
        policy_fwd_kernel,
        out_shape=jax.ShapeDtypeStruct((b_pad, two_a), jnp.float32),
        grid_spec=grid_spec,
        compiler_params=pltpu.CompilerParams(
            dimension_semantics=("parallel",),
            vmem_limit_bytes=vmem_limit,
        ),
    )(state, noise, w1f, b1f, params["w2"], params["b2"])

    out = out[:B]
    return out[:, :A], out[:, A:]


# -----------------------------------------------------------------------------
# Pure-JAX reference (no noise) for a correctness sanity check
# -----------------------------------------------------------------------------
def ref_forward_no_noise(state, params):
    x = state
    mu = x.mean(-1, keepdims=True)
    var = ((x - mu) ** 2).mean(-1, keepdims=True)
    xn = (x - mu) / jnp.sqrt(var + 1e-5)
    xa = xn * params["ln_w"] + params["ln_b"]
    h = jnp.maximum(xa @ params["w1"] + params["b1"], 0.0)
    out = h @ params["w2"] + params["b2"]
    A = out.shape[-1] // 2
    mean = jnp.clip(out[:, :A], -10.0, 10.0)
    log_std = jnp.clip(out[:, A:], -20.0, 2.0)
    return mean, log_std


if __name__ == "__main__":
    # Small shapes consistent with the module
    batch = 8
    state_dim = 32
    action_dim = 8
    hidden_dim = 128

    key = jax.random.PRNGKey(0)
    k_state, k_params, k_noise = jax.random.split(key, 3)

    state = jax.random.normal(k_state, (batch, state_dim), jnp.float32)
    params = init_params(k_params, state_dim, action_dim, hidden_dim)

    mean, log_std = progressive_policy_forward(state, params, k_noise)
    jax.block_until_ready((mean, log_std))

    assert mean.shape == (batch, action_dim)
    assert log_std.shape == (batch, action_dim)
    assert bool(jnp.all(jnp.isfinite(mean))) and bool(jnp.all(jnp.isfinite(log_std)))
    assert bool(jnp.all(log_std >= -20.0)) and bool(jnp.all(log_std <= 2.0))
    assert bool(jnp.all(mean >= -10.0)) and bool(jnp.all(mean <= 10.0))

    # Sanity vs. pure-JAX reference: log_std is deterministic; mean differs only
    # by the host-generated N(0,1)*0.01 perturbation.
    mean_ref, log_std_ref = ref_forward_no_noise(state, params)
    assert bool(jnp.allclose(log_std, log_std_ref, atol=1e-4)), "log_std mismatch"
    assert bool(jnp.max(jnp.abs(mean - mean_ref)) < 0.2), "mean drifted beyond noise bound"

    print("KERNEL_OK")
</pallas_src>

<mosaic_0001>
module attributes {stable_mosaic.version = 11 : i64} {
  func.func @policy_fwd_kernel(%arg0: i32, %arg1: memref<8x32xf32, #tpu.memory_space<vmem>>, %arg2: memref<8x16xf32, #tpu.memory_space<vmem>>, %arg3: memref<32x128xf32, #tpu.memory_space<vmem>>, %arg4: memref<1x128xf32, #tpu.memory_space<vmem>>, %arg5: memref<128x16xf32, #tpu.memory_space<vmem>>, %arg6: memref<1x16xf32, #tpu.memory_space<vmem>>, %arg7: memref<8x16xf32, #tpu.memory_space<vmem>>) attributes {dimension_semantics = [#tpu.dimension_semantics<parallel>], iteration_bounds = array<i64: 1>, scalar_prefetch = 0 : i64, scratch_operands = 0 : i64, tpu.core_type = #tpu.core_type<tc>, window_params = [{transform_indices = @transform_0, window_bounds = array<i64: 8, 32>}, {transform_indices = @transform_1, window_bounds = array<i64: 8, 16>}, {pipeline_mode = #tpu.pipeline_mode<synchronous>, transform_indices = @transform_2, window_bounds = array<i64: 32, 128>}, {pipeline_mode = #tpu.pipeline_mode<synchronous>, transform_indices = @transform_3, window_bounds = array<i64: 1, 128>}, {pipeline_mode = #tpu.pipeline_mode<synchronous>, transform_indices = @transform_4, window_bounds = array<i64: 128, 16>}, {pipeline_mode = #tpu.pipeline_mode<synchronous>, transform_indices = @transform_5, window_bounds = array<i64: 1, 16>}, {transform_indices = @transform_6, window_bounds = array<i64: 8, 16>}]} {
    %c0 = arith.constant 0 : index
    %c0_0 = arith.constant 0 : index
    %0 = vector.load %arg1[%c0, %c0_0] : memref<8x32xf32, #tpu.memory_space<vmem>>, vector<8x32xf32>
    %cst = arith.constant dense<0.000000e+00> : vector<8xf32>
    %1 = vector.multi_reduction <add>, %0, %cst [1] : vector<8x32xf32> to vector<8xf32>
    %2 = vector.shape_cast %1 : vector<8xf32> to vector<8x1xf32>
    %cst_1 = arith.constant 3.200000e+01 : f32
    %3 = vector.broadcast %cst_1 : f32 to vector<8x1xf32>
    %4 = arith.divf %2, %3 : vector<8x1xf32>
    %5 = vector.broadcast %4 : vector<8x1xf32> to vector<8x32xf32>
    %6 = arith.subf %0, %5 : vector<8x32xf32>
    %7 = arith.mulf %6, %6 : vector<8x32xf32>
    %cst_2 = arith.constant dense<0.000000e+00> : vector<8xf32>
    %8 = vector.multi_reduction <add>, %7, %cst_2 [1] : vector<8x32xf32> to vector<8xf32>
    %9 = vector.shape_cast %8 : vector<8xf32> to vector<8x1xf32>
    %cst_3 = arith.constant 3.200000e+01 : f32
    %10 = vector.broadcast %cst_3 : f32 to vector<8x1xf32>
    %11 = arith.divf %9, %10 : vector<8x1xf32>
    %cst_4 = arith.constant 9.99999974E-6 : f32
    %12 = vector.broadcast %cst_4 : f32 to vector<8x1xf32>
    %13 = arith.addf %11, %12 : vector<8x1xf32>
    %14 = math.rsqrt %13 : vector<8x1xf32>
    %15 = vector.broadcast %14 : vector<8x1xf32> to vector<8x32xf32>
    %16 = arith.mulf %6, %15 : vector<8x32xf32>
    %c0_5 = arith.constant 0 : index
    %c0_6 = arith.constant 0 : index
    %17 = vector.load %arg3[%c0_5, %c0_6] : memref<32x128xf32, #tpu.memory_space<vmem>>, vector<32x128xf32>
    %cst_7 = arith.constant dense<0.000000e+00> : vector<8x128xf32>
    %18 = tpu.matmul %16, %17, %cst_7 {dimension_numbers = #tpu.dot_dimension_numbers<[1], [0], [0], [1], [0, 0, 1, 1], [], []>} : vector<8x32xf32>, vector<32x128xf32>, vector<8x128xf32> -> vector<8x128xf32>
    %c0_8 = arith.constant 0 : index
    %c0_9 = arith.constant 0 : index
    %19 = vector.load %arg4[%c0_8, %c0_9] : memref<1x128xf32, #tpu.memory_space<vmem>>, vector<1x128xf32>
    %20 = vector.broadcast %19 : vector<1x128xf32> to vector<8x128xf32>
    %21 = arith.addf %18, %20 : vector<8x128xf32>
    %cst_10 = arith.constant 0.000000e+00 : f32
    %22 = vector.broadcast %cst_10 : f32 to vector<8x128xf32>
    %23 = arith.maximumf %21, %22 : vector<8x128xf32>
    %c0_11 = arith.constant 0 : index
    %c0_12 = arith.constant 0 : index
    %24 = vector.load %arg5[%c0_11, %c0_12] : memref<128x16xf32, #tpu.memory_space<vmem>>, vector<128x16xf32>
    %cst_13 = arith.constant dense<0.000000e+00> : vector<8x16xf32>
    %25 = tpu.matmul %23, %24, %cst_13 {dimension_numbers = #tpu.dot_dimension_numbers<[1], [0], [0], [1], [0, 0, 1, 1], [], []>} : vector<8x128xf32>, vector<128x16xf32>, vector<8x16xf32> -> vector<8x16xf32>
    %c0_14 = arith.constant 0 : index
    %c0_15 = arith.constant 0 : index
    %26 = vector.load %arg6[%c0_14, %c0_15] : memref<1x16xf32, #tpu.memory_space<vmem>>, vector<1x16xf32>
    %27 = vector.broadcast %26 : vector<1x16xf32> to vector<8x16xf32>
    %28 = arith.addf %25, %27 : vector<8x16xf32>
    %c0_16 = arith.constant 0 : index
    %c0_17 = arith.constant 0 : index
    %29 = vector.load %arg2[%c0_16, %c0_17] : memref<8x16xf32, #tpu.memory_space<vmem>>, vector<8x16xf32>
    %30 = arith.addf %28, %29 : vector<8x16xf32>
    %31 = tpu.iota {dimensions = array<i32: 1>} : vector<8x16xi32>
    %c8_i32 = arith.constant 8 : i32
    %32 = vector.broadcast %c8_i32 : i32 to vector<8x16xi32>
    %33 = arith.cmpi slt, %31, %32 : vector<8x16xi32>
    %cst_18 = arith.constant -1.000000e+01 : f32
    %cst_19 = arith.constant 1.000000e+01 : f32
    %34 = vector.broadcast %cst_18 : f32 to vector<8x16xf32>
    %35 = arith.maximumf %34, %30 : vector<8x16xf32>
    %36 = vector.broadcast %cst_19 : f32 to vector<8x16xf32>
    %37 = arith.minimumf %36, %35 : vector<8x16xf32>
    %cst_20 = arith.constant -2.000000e+01 : f32
    %cst_21 = arith.constant 2.000000e+00 : f32
    %38 = vector.broadcast %cst_20 : f32 to vector<8x16xf32>
    %39 = arith.maximumf %38, %30 : vector<8x16xf32>
    %40 = vector.broadcast %cst_21 : f32 to vector<8x16xf32>
    %41 = arith.minimumf %40, %39 : vector<8x16xf32>
    %42 = arith.select %33, %37, %41 : vector<8x16xi1>, vector<8x16xf32>
    %c0_22 = arith.constant 0 : index
    %c0_23 = arith.constant 0 : index
    %43 = vector.load %arg7[%c0_22, %c0_23] : memref<8x16xf32, #tpu.memory_space<vmem>>, vector<8x16xf32>
    tpu.vector_store %arg7[%c0_22, %c0_23], %42 {strides = array<i32>} : memref<8x16xf32, #tpu.memory_space<vmem>>, vector<8x16xf32>,
    return
  }
  func.func @transform_0(%arg0: i32) -> (i32, i32) {
    %c0_i32 = arith.constant 0 : i32
    %c0_i32_0 = arith.constant 0 : i32
    return %arg0, %c0_i32 : i32, i32
  }
  func.func @transform_1(%arg0: i32) -> (i32, i32) {
    %c0_i32 = arith.constant 0 : i32
    %c0_i32_0 = arith.constant 0 : i32
    return %arg0, %c0_i32 : i32, i32
  }
  func.func @transform_2(%arg0: i32) -> (i32, i32) {
    %c0_i32 = arith.constant 0 : i32
    %c0_i32_0 = arith.constant 0 : i32
    %c0_i32_1 = arith.constant 0 : i32
    return %c0_i32, %c0_i32_0 : i32, i32
  }
  func.func @transform_3(%arg0: i32) -> (i32, i32) {
    %c0_i32 = arith.constant 0 : i32
    %c0_i32_0 = arith.constant 0 : i32
    %c0_i32_1 = arith.constant 0 : i32
    return %c0_i32, %c0_i32_0 : i32, i32
  }
  func.func @transform_4(%arg0: i32) -> (i32, i32) {
    %c0_i32 = arith.constant 0 : i32
    %c0_i32_0 = arith.constant 0 : i32
    %c0_i32_1 = arith.constant 0 : i32
    return %c0_i32, %c0_i32_0 : i32, i32
  }
  func.func @transform_5(%arg0: i32) -> (i32, i32) {
    %c0_i32 = arith.constant 0 : i32
    %c0_i32_0 = arith.constant 0 : i32
    %c0_i32_1 = arith.constant 0 : i32
    return %c0_i32, %c0_i32_0 : i32, i32
  }
  func.func @transform_6(%arg0: i32) -> (i32, i32) {
    %c0_i32 = arith.constant 0 : i32
    %c0_i32_0 = arith.constant 0 : i32
    return %arg0, %c0_i32 : i32, i32
  }
}

</mosaic_0001>

<bundles_post_ra>
// kernel: tpu_custom_call.1
= control target key start
LH: loop header
LB: loop body
LE: loop exit
PB: predicated region body
PF: predicated region fallthrough
CT: control target
= control target key end

     0   :  { %vm25_vm0 = vcmask 261120   ;;  %s306_s0 = inlined_call_operand.vmem [shape: f32[8,32], index: 0, kind: input, shape index: {}]   ;;  %s307_s1 = inlined_call_operand.vmem [shape: f32[8,16], index: 1, kind: input, shape index: {}]   ;;  %s308_s2 = inlined_call_operand.vmem [shape: f32[32,128], index: 2, kind: input, shape index: {}]   ;;  %s309_s3 = inlined_call_operand.vmem [shape: f32[1,128], index: 3, kind: input, shape index: {}]   ;;  %s310_s4 = inlined_call_operand.vmem [shape: f32[128,16], index: 4, kind: input, shape index: {}]   ;;  %s311_s5 = inlined_call_operand.vmem [shape: f32[1,16], index: 5, kind: input, shape index: {}]   ;;  %s312_s6 = inlined_call_operand.hbm [shape: f32[8,16], index: 6, kind: output, shape index: {}]  }
   0x1   :  { %v24_v0 = vld [vmem:[%s306_s0] sm:$0xff] }
   0x2   :  { %v26_v1 = vsel %vm25_vm0, %v24_v0, 0.0 }
   0x3   :  { %11 = vsyncpa [#allocation3], 0  ;;  %27 = vadd.xlane.f32.xlu0 %v26_v1  ;;  %v191_v2 = vmov 32.0   ;;  %v58_v14 = vld [vmem:[%s308_s2 + $0x18] sm:$0xff]  ;;  %v57_v15 = vld [vmem:[%s308_s2 + $0x10] sm:$0xff]  ;;  %v129_v50 = vlaneseq  ;;  %s146_s19 = sshll.u32 %s312_s6, 4  ;;  %s147_s19 = int_to_ptr.hbm [resolvable:$true] %s146_s19 }
   0x4   :  { %161 = vrcp.f32 %v191_v2  ;;  %78 = vmatpush.msra.mxu0 %v58_v14  ;;  %v56_v16 = vld [vmem:[%s308_s2 + $0x8] sm:$0xff]  ;;  %v55_v17 = vld [vmem:[%s308_s2] sm:$0xff]  ;;  %v102_v18 = vld [vmem:[%s310_s4 + $0x78] sm:$0xff]  ;;  %vm137_vm6 = vcmask 130048  }
   0x5   :  { %v101_v19 = vld [vmem:[%s310_s4 + $0x70] sm:$0xff]  ;;  %107 = vmatpush.msra.mxu1 %v102_v18  ;;  %v100_v20 = vld [vmem:[%s310_s4 + $0x68] sm:$0xff]  ;;  %v99_v21 = vld [vmem:[%s310_s4 + $0x60] sm:$0xff]  ;;  %v130_v54 = vand.u32 127, %v129_v50 }
   0x6   :  { %79 = vmatpush.msra.mxu0 %v57_v15  ;;  %v98_v22 = vld [vmem:[%s310_s4 + $0x58] sm:$0xff]  ;;  %v97_v25 = vld [vmem:[%s310_s4 + $0x50] sm:$0xff]  ;;  %v96_v27 = vld [vmem:[%s310_s4 + $0x48] sm:$0xff] }
   0x7   :  { %108 = vmatpush.msra.mxu1 %v101_v19  ;;  %v95_v28 = vld [vmem:[%s310_s4 + $0x40] sm:$0xff]  ;;  %v94_v29 = vld [vmem:[%s310_s4 + $0x38] sm:$0xff]  ;;  %v93_v30 = vld [vmem:[%s310_s4 + $0x30] sm:$0xff]  ;;  %vm131_vm5 = vcmp.lt.s32.totalorder %v130_v54, 8 }
   0x8   :  { %80 = vmatpush.msra.mxu0 %v56_v16  ;;  %v92_v32 = vld [vmem:[%s310_s4 + $0x28] sm:$0xff]  ;;  %v91_v34 = vld [vmem:[%s310_s4 + $0x20] sm:$0xff]  ;;  %v90_v36 = vld [vmem:[%s310_s4 + $0x18] sm:$0xff] }
   0x9   :  { %109 = vmatpush.msra.mxu1 %v100_v20  ;;  %v89_v42 = vld [vmem:[%s310_s4 + $0x10] sm:$0xff]  ;;  %v88_v43 = vld [vmem:[%s310_s4 + $0x8] sm:$0xff]  ;;  %v87_v44 = vld [vmem:[%s310_s4] sm:$0xff]  ;;  %s192_s4 = smov [#allocation2]  }
   0xa   :  { %v162_v3 = vpop.eup %161  ;;  %81 = vmatpush.msra.mxu0 %v55_v17  ;;  %v159_v45 = vld [vmem:[%s309_s3] ss:$0 sm:$0xff]  ;;  %s144_s3 = sshll.u32 %s192_s4, 4  ;;  %s145_s3 = int_to_ptr.vmem [resolvable:$true] %s144_s3 }
   0xb   :  { %v30_v4 = vmul.f32 32.0, %v162_v3  ;;  %vm34_vm1 = vweird.f32 %v162_v3  ;;  %110 = vmatpush.msra.mxu1 %v99_v21  ;;  %v160_v49 = vld [vmem:[%s311_s5] ss:$0 sm:$0xff] }
   0xc   :  { %v127_v52 = vld [vmem:[%s307_s1] sm:$0xff] }
   0xd   :  { %v31_v5 = vsub.f32 1.0, %v30_v4  ;;  %111 = vmatpush.msra.mxu1 %v98_v22 }
   0xf   :  { %v32_v6 = vmul.f32 %v162_v3, %v31_v5  ;;  %112 = vmatpush.msra.mxu1 %v97_v25 }
  0x11   :  { %v33_v7 = vadd.f32 %v162_v3, %v32_v6  ;;  %113 = vmatpush.msra.mxu1 %v96_v27 }
  0x13   :  { %v35_v8 = vsel %vm34_vm1, %v162_v3, %v33_v7  ;;  %114 = vmatpush.msra.mxu1 %v95_v28 }
  0x15   :  { %115 = vmatpush.msra.mxu1 %v94_v29 }
  0x17   :  { %116 = vmatpush.msra.mxu1 %v93_v30 }
  0x19   :  { %117 = vmatpush.msra.mxu1 %v92_v32 }
  0x1b   :  { %118 = vmatpush.msra.mxu1 %v91_v34 }
  0x1d   :  { %119 = vmatpush.msra.mxu1 %v90_v36 }
  0x1f   :  { %120 = vmatpush.msra.mxu1 %v89_v42 }
  0x21   :  { %121 = vmatpush.msra.mxu1 %v88_v43 }
  0x23   :  { %122 = vmatpush.msra.mxu1 %v87_v44 }
  0x76   :  { %v28_v9 = vpop.xlane.xlu0 %27 }
  0x77   :  { %v36_v10 = vmul.f32 %v35_v8, %v28_v9 }
  0x79   :  { %v37_v11 = vsub.f32 %v24_v0, %v36_v10 }
  0x7b   :  { %v38_v12 = vmul.f32 %v37_v11, %v37_v11 }
  0x7d   :  { %v39_v13 = vsel %vm25_vm0, %v38_v12, 0.0 }
  0x7e   :  { %40 = vadd.xlane.f32.xlu0 %v39_v13 }
  0xf1   :  { %v41_v23 = vpop.xlane.xlu0 %40 }
  0xf2   :  { %v42_v24 = vmul.f32 %v41_v23, %v35_v8 }
  0xf4   :  { %v43_v26 = vadd.f32 1e-05, %v42_v24 }
  0xf6   :  { %163 = vrsqrt.f32 %v43_v26  ;;  %vm50_vm3 = vweird.f32 %v43_v26 }
  0xfc   :  { %v164_v31 = vpop.eup %163 }
  0xfd   :  { %v45_v33 = vmul.f32 %v164_v31, %v43_v26  ;;  %vm51_vm2 = vweird.f32 %v164_v31 }
  0xfe   :  { %vm52_vm4 = vmor %vm50_vm3, %vm51_vm2 }
  0xff   :  { %v46_v35 = vmul.f32 %v164_v31, %v45_v33 }
 0x101   :  { %v47_v37 = vmul.f32 0.5, %v46_v35 }
 0x103   :  { %v48_v38 = vsub.f32 1.5, %v47_v37 }
 0x105   :  { %v49_v39 = vmul.f32 %v164_v31, %v48_v38 }
 0x107   :  { %v53_v40 = vsel %vm52_vm4, %v164_v31, %v49_v39 }
 0x108   :  { %v54_v41 = vmul.f32 %v53_v40, %v37_v11 }
 0x10a   :  { %155 = vmatmul.msk.f32.vlgmr.msra.gmra.mxu0 %vm25_vm0, %v54_v41 }
 0x187   :  { %v83_v46 = vpop.f32.mrf.mxu0 }
 0x188   :  { %v84_v47 = vadd.f32 %v159_v45, %v83_v46 }
 0x18a   :  { %v86_v48 = vmax.f32 %v84_v47, 0.0 }
 0x18c   :  { %123 = vmatmul.f32.vlgmr.msra.gmra.mxu1 %v86_v48 }
 0x209   :  { %v124_v51 = vpop.f32.mrf.mxu1 }
 0x20a   :  { %v125_v53 = vadd.f32 %v160_v49, %v124_v51 }
 0x20c   :  { %v128_v55 = vadd.f32 %v127_v52, %v125_v53 }
 0x20e   :  { %v134_v56 = vmax.f32 %v128_v55, -20.0  ;;  %v156_v57 = vclamps-f32 %v128_v55, 10.0 }
 0x210   :  { %v135_v58 = vmin.f32 %v134_v56, 2.0 }
 0x212   :  { %v136_v59 = vsel %vm131_vm5, %v156_v57, %v135_v58 }
 0x213   :  { %138 = vst.msk [vmem:[#allocation2] sm:$0xff] %vm137_vm6, %v136_v59 }
 0x214   :  { %149 = dma.vmem_to_hbm [thread:$0]  %s145_s3, 128, %s147_s19, [#allocation3]  }
 0x215   :  { %189 = dma.done.wait [#allocation3], 128  }
 0x216   :  { %190 = vsyncadd [#allocation3], 4294967168 }
 0x217   :  { %154 = vsyncpa [#allocation3], 1 }

</bundles_post_ra>
